<compile_context>
chip_gen: v6e
topology: v6e:2x2x1
jax: 0.10.0
libtpu: 0.0.40
codegen_flags: <defaults>
</compile_context>

<pallas_src>
import functools

import jax
import jax.numpy as jnp
import numpy as np
from jax.experimental import pallas as pl
from jax.experimental.pallas import tpu as pltpu

_LANE = 128


def _ru(x, m):
    return ((x + m - 1) // m) * m


def _sublane(itemsize):
    # 8 (f32) / 16 (bf16) / 32 (int8) rows per native VMEM tile.
    return max(8, 32 // max(1, itemsize))


def _vmem_budget_bytes():
    """Per-generation VMEM budget (leave compiler headroom, never claim it all)."""
    cap = 64 << 20  # conservative fallback (v7x-sized)
    try:
        info = pltpu.get_tpu_info()
        cap = int(getattr(info, "vmem_capacity_bytes", cap)) or cap
    except Exception:
        pass
    # 48 MiB on v7x (64 MiB physical), 96 MiB on v5e/v6e (128 MiB physical).
    return int(min(cap * 3 // 4, 96 << 20))


def _plan_relayout(pn, patch_len, itemsize):
    """Pick the on-chip relayout mode and estimate its lane-padded VMEM footprint.

    Returns (mode, cn, padded_bytes_per_block_row).
    """
    sub = _sublane(itemsize)
    # Direct path materializes (bc, pn, patch_len) and (bc, patch_len, pn),
    # each lane/sublane padded by the tiled layout.
    direct_row = (_ru(pn, sub) * _ru(patch_len, _LANE)
                  + _ru(patch_len, sub) * _ru(pn, _LANE)) * itemsize
    if patch_len >= _LANE:
        return "direct", pn, direct_row

    # Chunked path: transpose cn patches at a time (~256 payload lanes per
    # chunk), writing each transposed patch-position row straight into o_ref.
    cn = max(1, min(pn, 256 // patch_len))
    n_chunks = -(-pn // cn)
    if pn > cn and patch_len * n_chunks <= 192 and patch_len <= 32:
        chunk_row = (_ru(cn, sub) * _ru(patch_len, _LANE)
                     + _ru(patch_len, sub) * _ru(cn, _LANE)) * itemsize
        # Python-level unrolling may keep ~2 chunks live; be conservative.
        return "chunked", cn, 2 * chunk_row
    return "direct", pn, direct_row


def _choose_bc_tile(rows, row_bytes, padded_per_row, sub, budget, target_block,
                    headroom):
    """How many (b, c) rows per grid step, honoring VMEM budget and >=2 steps."""
    cost_per_row = 4 * row_bytes + padded_per_row  # 2x-buffered in+out + relayout
    bc = min(rows,
             max(1, (budget - headroom) // max(1, cost_per_row)),
             max(1, target_block // max(1, row_bytes)))
    # Keep >= 2 grid steps so both v7x TensorCores get work (harmless elsewhere).
    if rows > sub:
        half = _ru(-(-rows // 2), sub)
        bc = min(bc, min(half, rows - 1))
    if bc >= rows:
        return rows
    if bc >= sub:
        return (bc // sub) * sub
    return min(sub, rows)  # minimum legal tiled block


def _patchify_kernel(x_ref, o_ref, *, pn, patch_len, mode, cn):
    # x_ref / o_ref: (bc, L) lane-dense row slabs, L = pn * patch_len.
    bc = x_ref.shape[0]
    if mode == "direct":
        xb = x_ref[...].reshape(bc, pn, patch_len)
        o_ref[...] = jnp.swapaxes(xb, -1, -2).reshape(bc, patch_len * pn)
    else:
        # Chunked relayout: bounded lane-padded temporaries, static slices only.
        for n0 in range(0, pn, cn):
            c = min(cn, pn - n0)
            blk = x_ref[:, n0 * patch_len:(n0 + c) * patch_len]       # (bc, c*pl)
            blk_t = jnp.swapaxes(blk.reshape(bc, c, patch_len), -1, -2)  # (bc, pl, c)
            for p in range(patch_len):
                o_ref[:, p * pn + n0: p * pn + n0 + c] = blk_t[:, p, :]


def patchify(x, patch_len):
    """x: (B, C, L) -> (B, C, patch_len, L // patch_len) (torch.unfold + permute)."""
    B, C, L = x.shape
    if patch_len <= 0:
        raise ValueError("patch_len must be positive")
    pn = L // patch_len
    if pn == 0:
        raise ValueError("patch_len larger than sequence length")
    if L % patch_len:
        # torch.unfold drops the trailing remainder when stride == size.
        x = x[..., : pn * patch_len]
        L = pn * patch_len

    rows = B * C
    itemsize = jnp.dtype(x.dtype).itemsize
    row_bytes = L * itemsize
    sub = _sublane(itemsize)

    mode, cn, padded_per_row = _plan_relayout(pn, patch_len, itemsize)
    budget = _vmem_budget_bytes()
    target_block = min(16 << 20, budget // 6)   # ~16 MiB v5e/v6e, ~8 MiB v7x
    headroom = 4 << 20
    bc_tile = _choose_bc_tile(rows, row_bytes, padded_per_row, sub, budget,
                              target_block, headroom)

    need = 4 * bc_tile * row_bytes + bc_tile * padded_per_row + headroom
    vmem_limit = int(max(min(budget, max(need, 16 << 20)), need))

    xr = x.reshape(rows, L)                       # pure view

    kernel = functools.partial(_patchify_kernel, pn=pn, patch_len=patch_len,
                               mode=mode, cn=cn)
    out_flat = pl.pallas_call(
        kernel,
        out_shape=jax.ShapeDtypeStruct((rows, L), x.dtype),
        grid=(pl.cdiv(rows, bc_tile),),
        in_specs=[pl.BlockSpec((bc_tile, L), lambda i: (i, 0))],
        out_specs=pl.BlockSpec((bc_tile, L), lambda i: (i, 0)),
        compiler_params=pltpu.CompilerParams(
            dimension_semantics=("parallel",),
            vmem_limit_bytes=vmem_limit,
        ),
    )(xr)

    return out_flat.reshape(B, C, patch_len, pn)  # pure view


def _ref(x_np, patch_len):
    B, C, L = x_np.shape
    pn = L // patch_len
    return (x_np[..., : pn * patch_len]
            .reshape(B, C, pn, patch_len)
            .transpose(0, 1, 3, 2))


if __name__ == "__main__":
    key = jax.random.PRNGKey(0)
    k1, k2, k3 = jax.random.split(key, 3)

    # Case 1: small shape matching the module's typical use (direct path).
    B, C, L, patch_len = 2, 4, 16, 4
    x1 = jax.random.normal(k1, (B, C, L), dtype=jnp.float32)
    out1 = jax.block_until_ready(patchify(x1, patch_len))
    assert out1.shape == (B, C, patch_len, L // patch_len), out1.shape
    np.testing.assert_array_equal(np.asarray(out1), _ref(np.asarray(x1), patch_len))

    # Case 2: chunked relayout path, 2-step grid with a ragged last row block
    # (B*C = 15, bc_tile = 8) and a ragged last patch chunk.
    B, C, L, patch_len = 3, 5, 384, 32
    x2 = jax.random.normal(k2, (B, C, L), dtype=jnp.float32)
    out2 = jax.block_until_ready(patchify(x2, patch_len))
    assert out2.shape == (B, C, patch_len, L // patch_len), out2.shape
    np.testing.assert_array_equal(np.asarray(out2), _ref(np.asarray(x2), patch_len))

    # Case 3: bf16 input (16-row sublane tiles), chunked path, 2-step grid.
    B, C, L, patch_len = 4, 6, 512, 8
    x3 = jax.random.normal(k3, (B, C, L), dtype=jnp.bfloat16)
    out3 = jax.block_until_ready(patchify(x3, patch_len))
    assert out3.shape == (B, C, patch_len, L // patch_len), out3.shape
    np.testing.assert_array_equal(np.asarray(out3), _ref(np.asarray(x3), patch_len))

    print("KERNEL_OK")
</pallas_src>

<mosaic_0001>
module attributes {stable_mosaic.version = 11 : i64} {
  func.func @_patchify_kernel(%arg0: i32, %arg1: memref<8x16xf32, #tpu.memory_space<vmem>>, %arg2: memref<8x16xf32, #tpu.memory_space<vmem>>) attributes {dimension_semantics = [#tpu.dimension_semantics<parallel>], iteration_bounds = array<i64: 1>, scalar_prefetch = 0 : i64, scratch_operands = 0 : i64, tpu.core_type = #tpu.core_type<tc>, window_params = [{transform_indices = @transform_0, window_bounds = array<i64: 8, 16>}, {transform_indices = @transform_1, window_bounds = array<i64: 8, 16>}]} {
    %c0 = arith.constant 0 : index
    %c0_0 = arith.constant 0 : index
    %0 = vector.load %arg1[%c0, %c0_0] : memref<8x16xf32, #tpu.memory_space<vmem>>, vector<8x16xf32>
    %1 = vector.shape_cast %0 : vector<8x16xf32> to vector<8x4x4xf32>
    %2 = tpu.transpose %1, [0, 2, 1] : vector<8x4x4xf32> -> vector<8x4x4xf32>
    %3 = vector.shape_cast %2 : vector<8x4x4xf32> to vector<8x16xf32>
    %c0_1 = arith.constant 0 : index
    %c0_2 = arith.constant 0 : index
    %4 = vector.load %arg2[%c0_1, %c0_2] : memref<8x16xf32, #tpu.memory_space<vmem>>, vector<8x16xf32>
    tpu.vector_store %arg2[%c0_1, %c0_2], %3 {strides = array<i32>} : memref<8x16xf32, #tpu.memory_space<vmem>>, vector<8x16xf32>,
    return
  }
  func.func @transform_0(%arg0: i32) -> (i32, i32) {
    %c0_i32 = arith.constant 0 : i32
    %c0_i32_0 = arith.constant 0 : i32
    return %arg0, %c0_i32 : i32, i32
  }
  func.func @transform_1(%arg0: i32) -> (i32, i32) {
    %c0_i32 = arith.constant 0 : i32
    %c0_i32_0 = arith.constant 0 : i32
    return %arg0, %c0_i32 : i32, i32
  }
}

</mosaic_0001>

<bundles_post_ra>
// kernel: tpu_custom_call.1
= control target key start
LH: loop header
LB: loop body
LE: loop exit
PB: predicated region body
PF: predicated region fallthrough
CT: control target
= control target key end

     0   :  { %6 = vsyncpa [#allocation3], 0  ;;  %s541_s0 = inlined_call_operand.hbm [shape: f32[8,16], index: 0, kind: input, shape index: {}]   ;;  %s542_s1 = inlined_call_operand.hbm [shape: f32[8,16], index: 1, kind: output, shape index: {}]  }
   0x1   :  { %7 = vsyncpa [#allocation4], 0  ;;  %s514_s6 = smov [#allocation2]  }
   0x2   :  { %s14_s7 = sshll.u32 %s514_s6, 4  ;;  %s15_s7 = int_to_ptr.vmem [resolvable:$true] %s14_s7 }
   0x3   :  { %s478_s8 = scalar_lea.vmem %s15_s7, 128  ;;  %p483_p1 = scmp.lt.s32.totalorder %s15_s7, %s15_s7 }
   0x4   :  { %p479_p0 = scmp.ne.s32.totalorder %s15_s7, %s478_s8  ;;  %p484_p2 = scmp.lt.s32.totalorder %s478_s8, %s478_s8 }
   0x6   :  { %p485_p3 = por %p484_p2, %p483_p1 }
   0x8   :  { %p486_p4 = pnand %p485_p3, %p479_p0 }
   0xa   :  { %489 = shalt.err (!%p486_p4)
}
   0xb   :  { %17 = dma.hbm_to_vmem [thread:$0]  %s541_s0, 128, %s15_s7, [#allocation3]  }
   0xc   :  { %510 = dma.done.wait [#allocation3], 128  }
   0xd   :  { %511 = vsyncadd [#allocation3], 4294967168  ;;  %v21_v0 = vld [vmem:[#allocation2] sm:$0xff]  ;;  %s515_s11 = smov 116   ;;  %s516_s12 = smov 124   ;;  %v37_v3 = vlaneseq  ;;  %v520_v28 = vmov 0.0  }
   0xe   :  { %29 = vrot.lane.b32.xlu1 %v21_v0, %s515_s11  ;;  %23 = vrot.lane.b32.xlu0 %v21_v0, %s516_s12  ;;  %s517_s13 = smov 120   ;;  %v518_v1 = vmov 1983009808   ;;  %v519_v6 = vmov 1934713408   ;;  %s521_s0 = smov 8  }
   0xf   :  { %v35_v2 = vunpack.c.l.s4 %v518_v1  ;;  %v38_v5 = vshrl.u32 %v37_v3, 7  ;;  %v67_v7 = vunpack.c.l.s4 %v519_v6  ;;  %s522_s14 = smov 4   ;;  %s523_s15 = smov 12   ;;  %vm436_vm0 = vcmask 31744  }
  0x10   :  { %vm438_vm1 = vcmask 64512   ;;  %s524_s16 = smov [#allocation5]   ;;  %vm440_vm2 = vcmask 97280   ;;  %vm442_vm3 = vcmask 130048  }
  0x11   :  { %v36_v4 = vunpack.c.0.s8 %v35_v2  ;;  %v68_v12 = vunpack.c.0.s8 %v67_v7  ;;  %s450_s17 = sshll.u32 %s524_s16, 4  ;;  %s451_s17 = int_to_ptr.vmem [resolvable:$true] %s450_s17 }
  0x12   :  { %26 = vrot.lane.b32.xlu0 %v21_v0, %s517_s13  ;;  %s490_s18 = scalar_lea.vmem %s451_s17, 128  ;;  %p495_p6 = scmp.lt.s32.totalorder %s451_s17, %s451_s17 }
  0x13   :  { %v39_v10 = vsub.s32 %v36_v4, %v38_v5  ;;  %v71_v20 = vsub.s32 %v68_v12, %v38_v5  ;;  %p491_p5 = scmp.ne.s32.totalorder %s451_s17, %s490_s18  ;;  %p496_p7 = scmp.lt.s32.totalorder %s490_s18, %s490_s18 }
  0x15   :  { %p497_p8 = por %p496_p7, %p495_p6 }
  0x17   :  { %p498_p9 = pnand %p497_p8, %p491_p5 }
  0x80   :  { %v30_v8 = vpop.permute.xlu1 %29  ;;  %v24_v9 = vpop.permute.xlu0 %23 }
  0x81   :  { %v48_v11 = vcombine.low %v24_v9, %v30_v8  ;;  %v49_v14 = vcombine.high %v24_v9, %v30_v8 }
  0x83   :  { %v56_v17 = vrot.slane %v48_v11, %v39_v10  ;;  %v63_v21 = vrot.slane %v49_v14, %v39_v10 }
  0x84   :  { %v27_v13 = vpop.permute.xlu0 %26 }
  0x85   :  { %v32_v15 = vcombine.low %v21_v0, %v27_v13  ;;  %v33_v16 = vcombine.high %v21_v0, %v27_v13 }
  0x87   :  { %v40_v18 = vrot.slane %v32_v15, %v39_v10  ;;  %v47_v19 = vrot.slane %v33_v16, %v39_v10 }
  0x89   :  { %v65_v22 = vcombine.high %v40_v18, %v56_v17  ;;  %v64_v23 = vcombine.low %v40_v18, %v56_v17  ;;  %v80_v26 = vcombine.low %v47_v19, %v63_v21  ;;  %v81_v30 = vcombine.high %v47_v19, %v63_v21 }
  0x8b   :  { %v79_v24 = vrot.slane %v65_v22, %v71_v20  ;;  %v72_v25 = vrot.slane %v64_v23, %v71_v20  ;;  %v88_v27 = vrot.slane %v80_v26, %v71_v20  ;;  %v95_v31 = vrot.slane %v81_v30, %v71_v20 }
  0x8d   :  { %164 = vxpose.xlu0.b32.start.end [1/1] (short) (narrow) %v79_v24, 8  ;;  %100 = vxpose.xlu1.b32.start.end [1/1] (short) (narrow) %v72_v25, 8  ;;  %v96_v29 = vcombine.high %v72_v25, %v520_v28  ;;  %v97_v32 = vcombine.high %v79_v24, %v520_v28  ;;  %v98_v33 = vcombine.high %v88_v27, %v520_v28 }
  0x8e   :  { %v99_v34 = vcombine.high %v95_v31, %v520_v28 }
  0x91   :  { %228 = vxpose.xlu1.b32.start.end [1/1] (short) (narrow) %v88_v27, 8  ;;  %132 = vxpose.xlu0.b32.start.end [1/1] (short) (narrow) %v96_v29, 8 }
  0x95   :  { %292 = vxpose.xlu1.b32.start.end [1/1] (short) (narrow) %v95_v31, 8  ;;  %196 = vxpose.xlu0.b32.start.end [1/1] (short) (narrow) %v97_v32, 8 }
  0x99   :  { %260 = vxpose.xlu0.b32.start.end [1/1] (short) (narrow) %v98_v33, 8 }
  0x9d   :  { %324 = vxpose.xlu0.b32.start.end [1/1] (short) (narrow) %v99_v34, 8 }
 0x109   :  { %v180_v35 = vpop.trf.xlu0  ;;  %v116_v36 = vpop.trf.xlu1 }
 0x10a   :  { %v356_v43 = vcombine.low %v116_v36, %v180_v35 }
 0x10c   :  { %v363_v47 = vrot.slane %v356_v43, %v39_v10 }
 0x10d   :  { %v148_v37 = vpop.trf.xlu0  ;;  %v244_v38 = vpop.trf.xlu1 }
 0x111   :  { %v212_v39 = vpop.trf.xlu0  ;;  %v308_v41 = vpop.trf.xlu1 }
 0x112   :  { %v364_v40 = vcombine.low %v148_v37, %v212_v39  ;;  %v372_v45 = vcombine.low %v244_v38, %v308_v41 }
 0x114   :  { %v371_v44 = vrot.slane %v364_v40, %v39_v10  ;;  %v379_v51 = vrot.slane %v372_v45, %v39_v10 }
 0x115   :  { %v276_v42 = vpop.trf.xlu0 }
 0x116   :  { %v388_v49 = vcombine.low %v363_v47, %v371_v44  ;;  %v389_v50 = vcombine.high %v363_v47, %v371_v44 }
 0x118   :  { %v403_v55 = vrot.slane %v389_v50, %v71_v20  ;;  %v396_v57 = vrot.slane %v388_v49, %v71_v20 }
 0x119   :  { %v340_v46 = vpop.trf.xlu0 }
 0x11a   :  { %v380_v48 = vcombine.low %v276_v42, %v340_v46 }
 0x11c   :  { %v387_v52 = vrot.slane %v380_v48, %v39_v10 }
 0x11e   :  { %v404_v53 = vcombine.low %v379_v51, %v387_v52  ;;  %v405_v54 = vcombine.high %v379_v51, %v387_v52 }
 0x120   :  { %v419_v56 = vrot.slane %v405_v54, %v71_v20  ;;  %v412_v58 = vrot.slane %v404_v53, %v71_v20 }
 0x122   :  { %v422_v59 = vcombine.low %v403_v55, %v419_v56  ;;  %v421_v60 = vcombine.high %v396_v57, %v412_v58  ;;  %v420_v61 = vcombine.low %v396_v57, %v412_v58  ;;  %v423_v62 = vcombine.high %v403_v55, %v419_v56 }
 0x124   :  { %429 = vrot.lane.b32.xlu0 %v422_v59, %s521_s0  ;;  %425 = vrot.lane.b32.xlu1 %v421_v60, %s522_s14 }
 0x128   :  { %433 = vrot.lane.b32.xlu1 %v423_v62, %s523_s15 }
 0x196   :  { %v426_v63 = vpop.permute.xlu1 %425  ;;  %v430_v0 = vpop.permute.xlu0 %429 }
 0x197   :  { %v437_v1 = vsel %vm436_vm0, %v420_v61, %v426_v63 }
 0x198   :  { %v439_v3 = vsel %vm438_vm1, %v437_v1, %v430_v0 }
 0x19a   :  { %v434_v2 = vpop.permute.xlu1 %433 }
 0x19b   :  { %v441_v4 = vsel %vm440_vm2, %v439_v3, %v434_v2 }
 0x19c   :  { %443 = vst.msk [vmem:[#allocation5] sm:$0xff] %vm442_vm3, %v441_v4 }
 0x19d   :  { %501 = shalt.err (!%p498_p9)
}
 0x19e   :  { %453 = dma.vmem_to_hbm [thread:$0]  %s451_s17, 128, %s542_s1, [#allocation4]  }
 0x19f   :  { %512 = dma.done.wait [#allocation4], 128  }
 0x1a0   :  { %513 = vsyncadd [#allocation4], 4294967168 }
 0x1a1   :  { %457 = vsyncpa [#allocation3], 1 }
 0x1a2   :  { %458 = vsyncpa [#allocation4], 1 }

</bundles_post_ra>
